<compile_context>
chip_gen: v5e
topology: v5e:2x2
jax: 0.10.0
libtpu: 0.0.40
codegen_flags: <defaults>
</compile_context>

<pallas_src>
import functools

import jax
import jax.numpy as jnp
from jax.experimental import pallas as pl
from jax.experimental.pallas import tpu as pltpu


HIDDEN = 256                      # fixed by the module (fc1: state_dim -> 256)
DEFAULT_BLOCK_B = 512             # max batch tile
_MIN_STEP_BYTES = 256 * 1024      # keep per-step DMA >> ~0.35us per-step overhead
_VMEM_LIMIT_BYTES = 32 * 1024 * 1024   # <= physical on every chip (v7x: 64 MiB)
_VMEM_BUDGET = 24 * 1024 * 1024        # target working set, headroom under the limit


def _round_up(x, m):
    return ((x + m - 1) // m) * m


def _chip_info():
    """(MXU M-tile alignment, TensorCores per chip) with safe defaults."""
    align, num_tc = 256, 1                   # v6e-style defaults
    try:
        kind = jax.devices()[0].device_kind.lower()
    except Exception:
        return align, num_tc
    if "v5 lite" in kind or "v5e" in kind or "v5lite" in kind:
        align = 128                          # v5e MXU is 128x128
    if "v7" in kind or "7x" in kind:
        num_tc = 2                           # v7x: two TensorCores share the grid
    return align, num_tc


def _latent_encoder_kernel(x_ref, w1_ref, b1_ref, w2_ref, b2_ref, o_ref,
                           *, compute_dtype):
    """Fused MLP tile: relu(relu(x @ W1 + b1) @ W2 + b2).

    Inputs arrive in f32 from HBM; the bf16 casts happen here in VMEM so no
    separate XLA convert pass (extra HBM round trip) is needed.  Both matmuls
    accumulate in f32 on the MXU; bias-add + ReLU run on the f32 accumulator
    (v5e's VPU has no bf16).  The store casts to the requested output dtype.
    """
    x = x_ref[...].astype(compute_dtype)                   # (TB, S)
    w1 = w1_ref[...].astype(compute_dtype)                 # (S, H)
    h = jnp.dot(x, w1, preferred_element_type=jnp.float32)  # (TB, H) f32 acc
    h = jnp.maximum(h + b1_ref[...], 0.0)                   # bias broadcast (1, H)
    w2 = w2_ref[...].astype(compute_dtype)                  # (H, Lp)
    y = jnp.dot(h.astype(compute_dtype), w2,
                preferred_element_type=jnp.float32)          # (TB, Lp) f32 acc
    y = jnp.maximum(y + b2_ref[...], 0.0)
    o_ref[...] = y.astype(o_ref.dtype)


def _choose_block_b(B, block_b, S, L_pad, out_itemsize, align, num_tc):
    """Pick the batch tile.

    As large as `block_b`, but split into enough grid steps that (a) the
    BlockSpec pipeline gets >=4 steps per TensorCore at large B (prefetch i+1
    / writeback i-1 overlap compute of i) and (b) both TensorCores get work
    on v7x for mid-size batches -- without shrinking a step below
    ~_MIN_STEP_BYTES of HBM traffic, where per-step overhead would dominate.
    """
    B8 = _round_up(B, 8)
    bb = min(block_b, B8)
    row_bytes = S * 4 + L_pad * out_itemsize          # HBM bytes per batch row

    # Deepest useful pipelining first, MXU M-aligned (256 on v6e/v7x, 128 on v5e).
    for steps in (4 * num_tc, 2 * num_tc):
        cand = max(align, _round_up(pl.cdiv(B8, steps), align))
        if cand < bb and cand * row_bytes >= _MIN_STEP_BYTES:
            return cand
    # v7x: even if the above is too fine-grained, split 2-way (128-aligned
    # tiles are fine) as soon as B >= 256 so the second TensorCore isn't idle.
    if num_tc > 1 and B8 >= 2 * 128:
        cand = max(128, _round_up(pl.cdiv(B8, num_tc), 128))
        if cand < bb:
            return cand
    return max(bb, 8)


def _fit_vmem(bb, S, H, L_pad, out_itemsize, budget):
    """Shrink bb until the per-tile VMEM working set fits the budget
    (matters on v7x's 64 MiB VMEM with large latent_dim)."""
    def footprint(b):
        x_tiles = 2 * b * S * 4                         # double-buffered f32 x tile
        o_tiles = 2 * b * L_pad * out_itemsize          # double-buffered out tile
        weights = (S * H + H * L_pad + H + L_pad) * 4   # single-buffered, f32
        scratch = b * (S * 2 + H * 6 + L_pad * 4)       # bf16 x/h + f32 h/y temps
        return x_tiles + o_tiles + weights + scratch
    while bb > 8 and footprint(bb) > budget:
        bb = max(8, _round_up(bb // 2, 8))
    return bb


@functools.partial(jax.jit, static_argnames=("block_b", "use_bf16", "out_dtype"))
def latent_encoder_forward(state, w1, b1, w2, b2, *,
                           block_b=DEFAULT_BLOCK_B, use_bf16=True,
                           out_dtype=jnp.bfloat16):
    """Pallas forward pass. Returns the latent representation (B, latent_dim).

    state: (B, state_dim) float32
    w1:    (state_dim, 256), b1: (1, 256)
    w2:    (256, latent_dim), b2: (1, latent_dim)

    use_bf16=True casts activations/weights to bf16 *inside the kernel* (f32
    MXU accumulation); use_bf16=False + out_dtype=jnp.float32 reproduces the
    PyTorch f32 module exactly.
    """
    B, S = state.shape
    H = w1.shape[1]
    L = w2.shape[1]
    out_itemsize = jnp.dtype(out_dtype).itemsize

    align, num_tc = _chip_info()

    # Lane-dense output only when latent_dim isn't already 128-aligned.
    L_pad = L if L % 128 == 0 else _round_up(L, 128)

    bb = _choose_block_b(B, block_b, S, L_pad, out_itemsize, align, num_tc)
    bb = _fit_vmem(bb, S, H, L_pad, out_itemsize, _VMEM_BUDGET)
    B_pad = B if B % bb == 0 else _round_up(B, bb)

    # Pad only when required; aligned shapes go straight through (no extra
    # HBM pass before or after the kernel).
    x = state
    if B_pad != B:
        x = jnp.pad(x, ((0, B_pad - B), (0, 0)))
    w2p, b2p = w2, b2
    if L_pad != L:
        w2p = jnp.pad(w2, ((0, 0), (0, L_pad - L)))
        b2p = jnp.pad(b2, ((0, 0), (0, L_pad - L)))

    compute_dtype = jnp.bfloat16 if use_bf16 else jnp.float32
    kernel = functools.partial(_latent_encoder_kernel, compute_dtype=compute_dtype)

    grid = (B_pad // bb,)

    flops = 2 * B_pad * (S * H + H * L_pad)
    bytes_accessed = (B_pad * S * 4                       # x (f32, read once)
                      + (S * H + H * L_pad + H + L_pad) * 4  # weights + biases (f32)
                      + B_pad * L_pad * out_itemsize)     # output

    # Grid-invariant weights/biases: constant index_map + single buffer.
    def _const_spec(shape):
        return pl.BlockSpec(shape, lambda i: (0, 0), pipeline_mode=pl.Buffered(1))

    out = pl.pallas_call(
        kernel,
        out_shape=jax.ShapeDtypeStruct((B_pad, L_pad), out_dtype),
        grid_spec=pltpu.PrefetchScalarGridSpec(
            num_scalar_prefetch=0,
            grid=grid,
            in_specs=[
                pl.BlockSpec((bb, S), lambda i: (i, 0)),    # x tile over batch
                _const_spec((S, H)),                        # W1 (VMEM-resident)
                _const_spec((1, H)),                        # b1
                _const_spec((H, L_pad)),                    # W2
                _const_spec((1, L_pad)),                    # b2
            ],
            out_specs=pl.BlockSpec((bb, L_pad), lambda i: (i, 0)),
        ),
        compiler_params=pltpu.CompilerParams(
            dimension_semantics=("parallel",),
            vmem_limit_bytes=_VMEM_LIMIT_BYTES),
        cost_estimate=pl.CostEstimate(
            flops=flops, transcendentals=0, bytes_accessed=bytes_accessed),
    )(x, w1, b1, w2p, b2p)

    if B_pad != B or L_pad != L:
        out = out[:B, :L]
    return out


def init_params(key, state_dim, latent_dim):
    """Deterministic init mimicking nn.Linear default (uniform +/- 1/sqrt(fan_in))."""
    k1, k2, k3, k4 = jax.random.split(key, 4)
    bound1 = 1.0 / jnp.sqrt(jnp.float32(state_dim))
    bound2 = 1.0 / jnp.sqrt(jnp.float32(HIDDEN))
    w1 = jax.random.uniform(k1, (state_dim, HIDDEN), jnp.float32, -bound1, bound1)
    b1 = jax.random.uniform(k2, (1, HIDDEN), jnp.float32, -bound1, bound1)
    w2 = jax.random.uniform(k3, (HIDDEN, latent_dim), jnp.float32, -bound2, bound2)
    b2 = jax.random.uniform(k4, (1, latent_dim), jnp.float32, -bound2, bound2)
    return w1, b1, w2, b2


def reference_forward_f32(state, w1, b1, w2, b2):
    h = jnp.maximum(state @ w1 + b1, 0.0)
    return jnp.maximum(h @ w2 + b2, 0.0)


def reference_forward_bf16(state, w1, b1, w2, b2):
    """Mimics the kernel's bf16 casts + f32 accumulation (output left in f32)."""
    h = jnp.dot(state.astype(jnp.bfloat16), w1.astype(jnp.bfloat16),
                preferred_element_type=jnp.float32)
    h = jnp.maximum(h + b1, 0.0)
    y = jnp.dot(h.astype(jnp.bfloat16), w2.astype(jnp.bfloat16),
                preferred_element_type=jnp.float32)
    return jnp.maximum(y + b2, 0.0)


if __name__ == "__main__":
    state_dim = 32
    latent_dim = 64
    batch = 8

    key = jax.random.PRNGKey(0)
    k_x, k_p = jax.random.split(key)
    state = jax.random.normal(k_x, (batch, state_dim), jnp.float32)
    w1, b1, w2, b2 = init_params(k_p, state_dim, latent_dim)

    # Default fast path: bf16 compute / bf16 output, f32 MXU accumulation.
    latent = latent_encoder_forward(state, w1, b1, w2, b2)
    latent = jax.block_until_ready(latent)
    memoized = False  # matches torch module's (x, False) return on cache miss

    assert latent.shape == (batch, latent_dim)

    latent_f32view = latent.astype(jnp.float32)
    ref_bf16 = reference_forward_bf16(state, w1, b1, w2, b2)
    assert jnp.allclose(latent_f32view, ref_bf16, atol=2e-2, rtol=2e-2), \
        "mismatch vs bf16 reference"

    ref_f32 = reference_forward_f32(state, w1, b1, w2, b2)
    assert jnp.allclose(latent_f32view, ref_f32, atol=5e-2, rtol=5e-2), \
        "mismatch vs f32 reference"

    # Exact-precision path (matches the PyTorch f32 module numerics).
    latent_exact = latent_encoder_forward(state, w1, b1, w2, b2,
                                          use_bf16=False, out_dtype=jnp.float32)
    latent_exact = jax.block_until_ready(latent_exact)
    assert jnp.allclose(latent_exact, ref_f32, atol=1e-5, rtol=1e-5), \
        "f32 path mismatch vs f32 reference"

    assert memoized is False

    print("KERNEL_OK")
</pallas_src>

<mosaic_0001>
module attributes {stable_mosaic.version = 11 : i64} {
  func.func @_latent_encoder_kernel(%arg0: i32, %arg1: memref<8x32xf32, #tpu.memory_space<vmem>>, %arg2: memref<32x256xf32, #tpu.memory_space<vmem>>, %arg3: memref<1x256xf32, #tpu.memory_space<vmem>>, %arg4: memref<256x128xf32, #tpu.memory_space<vmem>>, %arg5: memref<1x128xf32, #tpu.memory_space<vmem>>, %arg6: memref<8x128xbf16, #tpu.memory_space<vmem>>) attributes {dimension_semantics = [#tpu.dimension_semantics<parallel>], iteration_bounds = array<i64: 1>, scalar_prefetch = 0 : i64, scratch_operands = 0 : i64, tpu.core_type = #tpu.core_type<tc>, window_params = [{transform_indices = @transform_0, window_bounds = array<i64: 8, 32>}, {pipeline_mode = #tpu.pipeline_mode<synchronous>, transform_indices = @transform_1, window_bounds = array<i64: 32, 256>}, {pipeline_mode = #tpu.pipeline_mode<synchronous>, transform_indices = @transform_2, window_bounds = array<i64: 1, 256>}, {pipeline_mode = #tpu.pipeline_mode<synchronous>, transform_indices = @transform_3, window_bounds = array<i64: 256, 128>}, {pipeline_mode = #tpu.pipeline_mode<synchronous>, transform_indices = @transform_4, window_bounds = array<i64: 1, 128>}, {transform_indices = @transform_5, window_bounds = array<i64: 8, 128>}]} {
    %c0 = arith.constant 0 : index
    %c0_0 = arith.constant 0 : index
    %0 = vector.load %arg1[%c0, %c0_0] : memref<8x32xf32, #tpu.memory_space<vmem>>, vector<8x32xf32>
    %1 = arith.truncf %0 : vector<8x32xf32> to vector<8x32xbf16>
    %c0_1 = arith.constant 0 : index
    %c0_2 = arith.constant 0 : index
    %2 = vector.load %arg2[%c0_1, %c0_2] : memref<32x256xf32, #tpu.memory_space<vmem>>, vector<32x256xf32>
    %3 = arith.truncf %2 : vector<32x256xf32> to vector<32x256xbf16>
    %cst = arith.constant dense<0.000000e+00> : vector<8x256xf32>
    %4 = tpu.matmul %1, %3, %cst {dimension_numbers = #tpu.dot_dimension_numbers<[1], [0], [0], [1], [0, 0, 1, 1], [], []>} : vector<8x32xbf16>, vector<32x256xbf16>, vector<8x256xf32> -> vector<8x256xf32>
    %c0_3 = arith.constant 0 : index
    %c0_4 = arith.constant 0 : index
    %5 = vector.load %arg3[%c0_3, %c0_4] : memref<1x256xf32, #tpu.memory_space<vmem>>, vector<1x256xf32>
    %6 = vector.broadcast %5 : vector<1x256xf32> to vector<8x256xf32>
    %7 = arith.addf %4, %6 : vector<8x256xf32>
    %cst_5 = arith.constant 0.000000e+00 : f32
    %8 = vector.broadcast %cst_5 : f32 to vector<8x256xf32>
    %9 = arith.maximumf %7, %8 : vector<8x256xf32>
    %c0_6 = arith.constant 0 : index
    %c0_7 = arith.constant 0 : index
    %10 = vector.load %arg4[%c0_6, %c0_7] : memref<256x128xf32, #tpu.memory_space<vmem>>, vector<256x128xf32>
    %11 = arith.truncf %10 : vector<256x128xf32> to vector<256x128xbf16>
    %12 = arith.truncf %9 : vector<8x256xf32> to vector<8x256xbf16>
    %cst_8 = arith.constant dense<0.000000e+00> : vector<8x128xf32>
    %13 = tpu.matmul %12, %11, %cst_8 {dimension_numbers = #tpu.dot_dimension_numbers<[1], [0], [0], [1], [0, 0, 1, 1], [], []>} : vector<8x256xbf16>, vector<256x128xbf16>, vector<8x128xf32> -> vector<8x128xf32>
    %c0_9 = arith.constant 0 : index
    %c0_10 = arith.constant 0 : index
    %14 = vector.load %arg5[%c0_9, %c0_10] : memref<1x128xf32, #tpu.memory_space<vmem>>, vector<1x128xf32>
    %15 = vector.broadcast %14 : vector<1x128xf32> to vector<8x128xf32>
    %16 = arith.addf %13, %15 : vector<8x128xf32>
    %cst_11 = arith.constant 0.000000e+00 : f32
    %17 = vector.broadcast %cst_11 : f32 to vector<8x128xf32>
    %18 = arith.maximumf %16, %17 : vector<8x128xf32>
    %19 = arith.truncf %18 : vector<8x128xf32> to vector<8x128xbf16>
    %c0_12 = arith.constant 0 : index
    %c0_13 = arith.constant 0 : index
    %20 = vector.load %arg6[%c0_12, %c0_13] : memref<8x128xbf16, #tpu.memory_space<vmem>>, vector<8x128xbf16>
    tpu.vector_store %arg6[%c0_12, %c0_13], %19 {strides = array<i32>} : memref<8x128xbf16, #tpu.memory_space<vmem>>, vector<8x128xbf16>,
    return
  }
  func.func @transform_0(%arg0: i32) -> (i32, i32) {
    %c0_i32 = arith.constant 0 : i32
    %c0_i32_0 = arith.constant 0 : i32
    return %arg0, %c0_i32 : i32, i32
  }
  func.func @transform_1(%arg0: i32) -> (i32, i32) {
    %c0_i32 = arith.constant 0 : i32
    %c0_i32_0 = arith.constant 0 : i32
    %c0_i32_1 = arith.constant 0 : i32
    return %c0_i32, %c0_i32_0 : i32, i32
  }
  func.func @transform_2(%arg0: i32) -> (i32, i32) {
    %c0_i32 = arith.constant 0 : i32
    %c0_i32_0 = arith.constant 0 : i32
    %c0_i32_1 = arith.constant 0 : i32
    return %c0_i32, %c0_i32_0 : i32, i32
  }
  func.func @transform_3(%arg0: i32) -> (i32, i32) {
    %c0_i32 = arith.constant 0 : i32
    %c0_i32_0 = arith.constant 0 : i32
    %c0_i32_1 = arith.constant 0 : i32
    return %c0_i32, %c0_i32_0 : i32, i32
  }
  func.func @transform_4(%arg0: i32) -> (i32, i32) {
    %c0_i32 = arith.constant 0 : i32
    %c0_i32_0 = arith.constant 0 : i32
    %c0_i32_1 = arith.constant 0 : i32
    return %c0_i32, %c0_i32_0 : i32, i32
  }
  func.func @transform_5(%arg0: i32) -> (i32, i32) {
    %c0_i32 = arith.constant 0 : i32
    %c0_i32_0 = arith.constant 0 : i32
    return %arg0, %c0_i32 : i32, i32
  }
}

</mosaic_0001>

<bundles_post_ra>
// kernel: latent_encoder_forward.1
= control target key start
LH: loop header
LB: loop body
LE: loop exit
PB: predicated region body
PF: predicated region fallthrough
CT: control target
= control target key end

     0   :  { %vm42_vm0 = vcmask 261120   ;;  %s366_s0 = inlined_call_operand.vmem [shape: f32[8,32], index: 0, kind: input, shape index: {}]   ;;  %s367_s1 = inlined_call_operand.vmem [shape: f32[32,256], index: 1, kind: input, shape index: {}]   ;;  %s368_s2 = inlined_call_operand.vmem [shape: f32[1,256], index: 2, kind: input, shape index: {}]   ;;  %s369_s3 = inlined_call_operand.vmem [shape: f32[256,128], index: 3, kind: input, shape index: {}]   ;;  %s370_s4 = inlined_call_operand.vmem [shape: f32[1,128], index: 4, kind: input, shape index: {}]   ;;  %s371_s5 = inlined_call_operand.hbm [shape: bf16[8,128], index: 5, kind: output, shape index: {}]  }
   0x1   :  { %v28_v0 = vld [vmem:[%s367_s1 + $0x20] sm:$0xff]  ;;  %v30_v1 = vld [vmem:[%s367_s1 + $0x30] sm:$0xff]  ;;  %v29_v2 = vld [vmem:[%s367_s1 + $0x28] sm:$0xff] }
   0x2   :  { %v34_v3 = vpack.c.bf16 %v30_v1, %v28_v0  ;;  %v31_v4 = vld [vmem:[%s367_s1 + $0x38] sm:$0xff]  ;;  %v24_v5 = vld [vmem:[%s367_s1] sm:$0xff]  ;;  %v26_v6 = vld [vmem:[%s367_s1 + $0x10] sm:$0xff] }
   0x3   :  { %v35_v7 = vpack.c.bf16 %v31_v4, %v29_v2  ;;  %v25_v8 = vld [vmem:[%s367_s1 + $0x8] sm:$0xff]  ;;  %v27_v9 = vld [vmem:[%s367_s1 + $0x18] sm:$0xff]  ;;  %v22_v10 = vld [vmem:[%s366_s0] sm:$0xff]  ;;  %v32_v11 = vpack.c.bf16 %v26_v6, %v24_v5 }
   0x4   :  { %52 = vmatpush.bf16.msra.mxu0 %v34_v3  ;;  %v88_v12 = vld [vmem:[%s369_s3 + $0x70] sm:$0xff]  ;;  %v89_v13 = vld [vmem:[%s369_s3 + $0x78] sm:$0xff]  ;;  %v33_v15 = vpack.c.bf16 %v27_v9, %v25_v8  ;;  %v86_v18 = vld [vmem:[%s369_s3 + $0x60] sm:$0xff]  ;;  %v23_v23 = vpack.c.bf16 %v22_v10, %v22_v10 }
   0x5   :  { %v104_v14 = vld [vmem:[%s369_s3 + $0xf0] sm:$0xff]  ;;  %65 = vmatpush.bf16.msra.mxu1 %v35_v7  ;;  %v113_v16 = vpack.c.bf16 %v89_v13, %v88_v12  ;;  %v105_v17 = vld [vmem:[%s369_s3 + $0xf8] sm:$0xff]  ;;  %v87_v19 = vld [vmem:[%s369_s3 + $0x68] sm:$0xff] }
   0x6   :  { %v121_v20 = vpack.c.bf16 %v105_v17, %v104_v14  ;;  %v102_v21 = vld [vmem:[%s369_s3 + $0xe0] sm:$0xff]  ;;  %v103_v22 = vld [vmem:[%s369_s3 + $0xe8] sm:$0xff]  ;;  %v112_v24 = vpack.c.bf16 %v87_v19, %v86_v18  ;;  %v84_v26 = vld [vmem:[%s369_s3 + $0x50] sm:$0xff] }
   0x7   :  { %128 = vmatpush.bf16.msra.mxu2 %v113_v16  ;;  %v120_v25 = vpack.c.bf16 %v103_v22, %v102_v21  ;;  %v85_v27 = vld [vmem:[%s369_s3 + $0x58] sm:$0xff]  ;;  %v100_v28 = vld [vmem:[%s369_s3 + $0xd0] sm:$0xff]  ;;  %v82_v31 = vld [vmem:[%s369_s3 + $0x40] sm:$0xff] }
   0x8   :  { %53 = vmatpush.bf16.msra.mxu0 %v32_v11  ;;  %141 = vmatpush.bf16.msra.mxu3 %v121_v20  ;;  %v101_v29 = vld [vmem:[%s369_s3 + $0xd8] sm:$0xff]  ;;  %v111_v30 = vpack.c.bf16 %v85_v27, %v84_v26  ;;  %v83_v33 = vld [vmem:[%s369_s3 + $0x48] sm:$0xff] }
   0x9   :  { %66 = vmatpush.bf16.msra.mxu1 %v33_v15  ;;  %v119_v32 = vpack.c.bf16 %v101_v29, %v100_v28 }
   0xb   :  { %173 = vmatmul.msk.bf16.vlgmr.msra.gmra.mxu0 %vm42_vm0, %v23_v23  ;;  %129 = vmatpush.bf16.msra.mxu2 %v112_v24 }
   0xc   :  { %174 = vmatmul.msk.bf16.vlgmr.msra.gmra.mxu1 %vm42_vm0, %v23_v23  ;;  %142 = vmatpush.bf16.msra.mxu3 %v120_v25 }
   0xd   :  { %10 = vsyncpa [#allocation3], 0  ;;  %v98_v34 = vld [vmem:[%s369_s3 + $0xc0] sm:$0xff]  ;;  %v99_v35 = vld [vmem:[%s369_s3 + $0xc8] sm:$0xff]  ;;  %v110_v36 = vpack.c.bf16 %v83_v33, %v82_v31  ;;  %s164_s25 = sshll.u32 %s371_s5, 4  ;;  %s165_s25 = int_to_ptr.hbm [resolvable:$true] %s164_s25 }
   0xe   :  { %v118_v37 = vpack.c.bf16 %v99_v35, %v98_v34  ;;  %v80_v38 = vld [vmem:[%s369_s3 + $0x30] sm:$0xff]  ;;  %v81_v39 = vld [vmem:[%s369_s3 + $0x38] sm:$0xff]  ;;  %v78_v44 = vld [vmem:[%s369_s3 + $0x20] sm:$0xff] }
   0xf   :  { %130 = vmatpush.bf16.msra.mxu2 %v111_v30  ;;  %v96_v40 = vld [vmem:[%s369_s3 + $0xb0] sm:$0xff]  ;;  %v97_v41 = vld [vmem:[%s369_s3 + $0xb8] sm:$0xff]  ;;  %v109_v42 = vpack.c.bf16 %v81_v39, %v80_v38  ;;  %v79_v45 = vld [vmem:[%s369_s3 + $0x28] sm:$0xff] }
  0x10   :  { %143 = vmatpush.bf16.msra.mxu3 %v119_v32  ;;  %v117_v43 = vpack.c.bf16 %v97_v41, %v96_v40  ;;  %v94_v46 = vld [vmem:[%s369_s3 + $0xa0] sm:$0xff]  ;;  %v95_v47 = vld [vmem:[%s369_s3 + $0xa8] sm:$0xff]  ;;  %v108_v48 = vpack.c.bf16 %v79_v45, %v78_v44  ;;  %v76_v50 = vld [vmem:[%s369_s3 + $0x10] sm:$0xff] }
  0x11   :  { %v116_v49 = vpack.c.bf16 %v95_v47, %v94_v46  ;;  %v77_v51 = vld [vmem:[%s369_s3 + $0x18] sm:$0xff]  ;;  %v92_v52 = vld [vmem:[%s369_s3 + $0x90] sm:$0xff]  ;;  %v74_v56 = vld [vmem:[%s369_s3] sm:$0xff] }
  0x12   :  { %v107_v53 = vpack.c.bf16 %v77_v51, %v76_v50  ;;  %v93_v54 = vld [vmem:[%s369_s3 + $0x98] sm:$0xff]  ;;  %v75_v57 = vld [vmem:[%s369_s3 + $0x8] sm:$0xff]  ;;  %v90_v58 = vld [vmem:[%s369_s3 + $0x80] sm:$0xff] }
  0x13   :  { %131 = vmatpush.bf16.msra.mxu2 %v110_v36  ;;  %v115_v55 = vpack.c.bf16 %v93_v54, %v92_v52  ;;  %v106_v59 = vpack.c.bf16 %v75_v57, %v74_v56  ;;  %v91_v60 = vld [vmem:[%s369_s3 + $0x88] sm:$0xff]  ;;  %v36_v62 = vld [vmem:[%s368_s2] sm:$0x3]  ;;  %s203_s2 = smov [#allocation2]  }
  0x14   :  { %144 = vmatpush.bf16.msra.mxu3 %v118_v37  ;;  %v114_v61 = vpack.c.bf16 %v91_v60, %v90_v58  ;;  %v38_v63 = vperm.slane %v36_v62, 0  ;;  %v39_v0 = vperm.slane %v36_v62, 1  ;;  %v176_v11 = vld [vmem:[%s370_s4] ss:$0 sm:$0xff]  ;;  %s162_s22 = sshll.u32 %s203_s2, 4  ;;  %s163_s22 = int_to_ptr.vmem [resolvable:$true] %s162_s22 }
  0x17   :  { %132 = vmatpush.bf16.msra.mxu2 %v109_v42 }
  0x18   :  { %145 = vmatpush.bf16.msra.mxu3 %v117_v43 }
  0x1b   :  { %133 = vmatpush.bf16.msra.mxu2 %v108_v48 }
  0x1c   :  { %146 = vmatpush.bf16.msra.mxu3 %v116_v49 }
  0x1f   :  { %134 = vmatpush.bf16.msra.mxu2 %v107_v53 }
  0x20   :  { %147 = vmatpush.bf16.msra.mxu3 %v115_v55 }
  0x23   :  { %135 = vmatpush.bf16.msra.mxu2 %v106_v59 }
  0x24   :  { %148 = vmatpush.bf16.msra.mxu3 %v114_v61 }
  0x88   :  { %v55_v1 = vpop.f32.mrf.mxu0 }
  0x89   :  { %v56_v2 = vadd.f32 %v55_v1, %v38_v63  ;;  %v68_v3 = vpop.f32.mrf.mxu1 }
  0x8a   :  { %v69_v4 = vadd.f32 %v68_v3, %v39_v0 }
  0x8b   :  { %v72_v5 = vmax.f32 %v56_v2, 0.0 }
  0x8c   :  { %v73_v6 = vmax.f32 %v69_v4, 0.0 }
  0x8d   :  { %v122_v7 = vpack.c.bf16 %v72_v5, %v72_v5 }
  0x8e   :  { %v123_v8 = vpack.c.bf16 %v73_v6, %v73_v6 }
  0x8f   :  { %136 = vmatmul.bf16.vlgmr.msra.gmra.mxu2 %v122_v7 }
  0x90   :  { %149 = vmatmul.bf16.vlgmr.msra.gmra.mxu3 %v123_v8  ;;  %v57_v9 = vpop.f32.mrf.mxu0 }
  0x91   :  { %v70_v10 = vpop.f32.mrf.mxu1 }
 0x112   :  { %v137_v12 = vpop.f32.mrf.mxu2 }
 0x113   :  { %v138_v13 = vadd.f32 %v176_v11, %v137_v12  ;;  %v150_v14 = vpop.f32.mrf.mxu3 }
 0x115   :  { %v151_v15 = vadd.f32 %v150_v14, %v138_v13 }
 0x117   :  { %v154_v16 = vmax.f32 %v151_v15, 0.0 }
 0x119   :  { %v155_v17 = vpack.c.bf16 %v154_v16, %v154_v16 }
 0x11a   :  { %v139_v18 = vpop.f32.mrf.mxu2 }
 0x11b   :  { %156 = vst [vmem:[#allocation2] sm:$0xf] %v155_v17  ;;  %v152_v19 = vpop.f32.mrf.mxu3 }
 0x11c   :  { %167 = dma.vmem_to_hbm [thread:$0]  %s163_s22, 64, %s165_s25, [#allocation3]  }
 0x11d   :  { %201 = dma.done.wait [#allocation3], 64  }
 0x11e   :  { %202 = vsyncadd [#allocation3], 4294967232 }
 0x11f   :  { %172 = vsyncpa [#allocation3], 1 }

</bundles_post_ra>
